<compile_context>
chip_gen: v6e
topology: v6e:2x2x1
jax: 0.10.0
libtpu: 0.0.40
codegen_flags: <defaults>
</compile_context>

<pallas_src>
import jax
import jax.numpy as jnp
from jax.experimental import pallas as pl
from jax.experimental.pallas import tpu as pltpu

EPS = 1e-5  # nn.BatchNorm2d default eps


def _sum_nhw(t):
    """Sum a (N, TC, H, W) block over N/H/W, keeping (1, TC, 1, 1)."""
    t = jnp.sum(t, axis=3, keepdims=True)   # lanes
    t = jnp.sum(t, axis=2, keepdims=True)   # sublanes
    t = jnp.sum(t, axis=0, keepdims=True)   # batch
    return t


def _make_up_bn_kernel(N, TC, H, W, eps):
    n_elem = float(N * H * W)
    W2 = 2 * W

    def kernel(x_ref, gamma_ref, beta_ref, r_ref, out_ref):
        xb = x_ref[...].astype(jnp.float32)                # (N, TC, H, W)

        # Training-mode batch statistics (biased variance).  Upsampling
        # replicates each value exactly 4x, so stats(up(x)) == stats(x).
        # Two-pass (centered) variance avoids E[x^2]-mean^2 cancellation.
        mean = _sum_nhw(xb) / n_elem                        # (1, TC, 1, 1)
        xc = xb - mean
        var = _sum_nhw(xc * xc) / n_elem
        inv_std = jax.lax.rsqrt(var + eps)

        scale = gamma_ref[...] * inv_std                    # (1, TC, 1, 1)
        y = xc * scale + beta_ref[...]                      # (N, TC, H, W)

        # Width (lane) duplication: a single un-batched exact 0/1 matmul.
        # Every column of R has exactly one 1, and HIGHEST precision keeps the
        # f32 operand bit-exact, so this is exact replication (not lowering
        # precision here on purpose -- default precision would round y to bf16).
        y2d = y.reshape(N * TC * H, W)
        z = jnp.dot(y2d, r_ref[...],
                    precision=jax.lax.Precision.HIGHEST,
                    preferred_element_type=jnp.float32)      # (N*TC*H, 2W)
        z = z.reshape(N, TC, H, W2).astype(out_ref.dtype)

        # Height duplication: the output block's last dim packs the two
        # replicated rows [2i, 2i+1] side by side ((N, C, H, 4W) is a free
        # row-major view of (N, C, 2H, 2W)), so it is just two stores of z.
        out_ref[:, :, :, 0:W2] = z
        out_ref[:, :, :, W2:2 * W2] = z

    return kernel


def _vmem_capacity_bytes():
    try:
        return int(pltpu.get_tpu_info().vmem_capacity_bytes)
    except Exception:
        return 64 * 1024 * 1024  # conservative (v7x-sized) fallback


def _channels_per_step(N, C, H, W, vmem_budget):
    """Channels per grid step.

    Per channel a step needs roughly (input + 4x output) double-buffered plus
    ~10x-input of live f32 temporaries (xb, xc, y, z) => ~20x input bytes.
    Keep >= 4 grid steps when C permits so v7x can shard the parallel axis
    across both TensorCores and still have something to pipeline per core;
    otherwise just maximize the block (single-TC chips only care about size).
    """
    per_channel = 20 * N * H * W * 4
    cap = max(1, vmem_budget // max(per_channel, 1))
    best_with_steps, best_any = 0, 1
    for d in range(1, C + 1):
        if C % d == 0 and d <= cap:
            best_any = d
            if C // d >= 4:
                best_with_steps = d
    return best_with_steps if best_with_steps else best_any


def up_bn2d(x, gamma, beta, eps=EPS):
    """x: (N, C, H, W) -> (N, C, 2H, 2W), matching Up_Bn2D.forward (training)."""
    N, C, H, W = x.shape
    itemsize = x.dtype.itemsize
    vmem_cap = _vmem_capacity_bytes()
    vmem_budget = (vmem_cap * 3) // 4   # leave headroom for Mosaic scratch/temps
    TC = _channels_per_step(N, C, H, W, vmem_budget)
    # TODO(synk): for very large N*H*W even TC=1 can exceed VMEM (esp. v7x's
    # 64 MiB); that regime needs an extra 'arbitrary' spatial grid axis with
    # accumulate-then-finalize statistics.

    # Exact 0/1 width-replication matrix: R[j, q] = 1 iff q // 2 == j.
    # Passed as a constant input with a constant index_map -> fetched once.
    R = (jnp.arange(W)[:, None] == (jnp.arange(2 * W) // 2)[None, :]).astype(
        jnp.float32)

    gamma4 = jnp.asarray(gamma, jnp.float32).reshape(1, C, 1, 1)
    beta4 = jnp.asarray(beta, jnp.float32).reshape(1, C, 1, 1)

    kernel = _make_up_bn_kernel(N, TC, H, W, eps)
    bytes_accessed = 5 * N * C * H * W * itemsize          # 1x read + 4x write
    flops = 4 * N * C * H * W * W + 10 * N * C * H * W

    out = pl.pallas_call(
        kernel,
        out_shape=jax.ShapeDtypeStruct((N, C, H, 4 * W), x.dtype),
        grid_spec=pltpu.PrefetchScalarGridSpec(
            num_scalar_prefetch=0,
            grid=(C // TC,),
            in_specs=[
                pl.BlockSpec((N, TC, H, W), lambda c: (0, c, 0, 0)),
                pl.BlockSpec((1, TC, 1, 1), lambda c: (0, c, 0, 0)),  # gamma
                pl.BlockSpec((1, TC, 1, 1), lambda c: (0, c, 0, 0)),  # beta
                pl.BlockSpec((W, 2 * W), lambda c: (0, 0)),           # R (const)
            ],
            out_specs=pl.BlockSpec((N, TC, H, 4 * W), lambda c: (0, c, 0, 0)),
        ),
        compiler_params=pltpu.CompilerParams(
            dimension_semantics=("parallel",),
            vmem_limit_bytes=int(vmem_budget),
        ),
        cost_estimate=pl.CostEstimate(
            flops=flops, transcendentals=C, bytes_accessed=bytes_accessed),
    )(x, gamma4, beta4, R)

    # Free reinterpretation: (N, C, H, 4W) row-major == (N, C, 2H, 2W).
    return out.reshape(N, C, 2 * H, 2 * W)


def up_bn2d_ref(x, gamma, beta, eps=EPS):
    """Pure-JAX reference matching PyTorch Up_Bn2D.forward (training mode)."""
    up = jnp.repeat(jnp.repeat(x, 2, axis=2), 2, axis=3)
    mean = jnp.mean(up, axis=(0, 2, 3), keepdims=True)
    var = jnp.mean((up - mean) ** 2, axis=(0, 2, 3), keepdims=True)
    y = (up - mean) * jax.lax.rsqrt(var + eps)
    return y * gamma[None, :, None, None] + beta[None, :, None, None]


if __name__ == "__main__":
    key = jax.random.PRNGKey(0)
    kx, kg, kb = jax.random.split(key, 3)
    N, C, H, W = 2, 4, 16, 16
    x = jax.random.normal(kx, (N, C, H, W), dtype=jnp.float32)
    # BatchNorm2d default init is weight=1, bias=0; use non-trivial values to
    # exercise the folded-affine path (same forward semantics).
    gamma = 1.0 + 0.1 * jax.random.normal(kg, (C,), dtype=jnp.float32)
    beta = 0.1 * jax.random.normal(kb, (C,), dtype=jnp.float32)
    # NOTE: running_mean / running_var updates do not affect the forward output
    # in training mode, so they are not modeled here.

    out = jax.block_until_ready(up_bn2d(x, gamma, beta))
    ref = up_bn2d_ref(x, gamma, beta)

    assert out.shape == (N, C, 2 * H, 2 * W)
    assert jnp.allclose(out, ref, atol=1e-4, rtol=1e-4), "mismatch vs reference"
    print("KERNEL_OK")
</pallas_src>

<mosaic_0001>
module attributes {stable_mosaic.version = 11 : i64} {
  func.func @kernel(%arg0: i32, %arg1: memref<2x1x16x16xf32, #tpu.memory_space<vmem>>, %arg2: memref<1x1x1x1xf32, #tpu.memory_space<vmem>>, %arg3: memref<1x1x1x1xf32, #tpu.memory_space<vmem>>, %arg4: memref<16x32xf32, #tpu.memory_space<vmem>>, %arg5: memref<2x1x16x64xf32, #tpu.memory_space<vmem>>) attributes {dimension_semantics = [#tpu.dimension_semantics<parallel>], iteration_bounds = array<i64: 4>, scalar_prefetch = 0 : i64, scratch_operands = 0 : i64, tpu.core_type = #tpu.core_type<tc>, window_params = [{transform_indices = @transform_0, window_bounds = array<i64: 2, 1, 16, 16>}, {transform_indices = @transform_1, window_bounds = array<i64: 1, 1, 1, 1>}, {transform_indices = @transform_2, window_bounds = array<i64: 1, 1, 1, 1>}, {pipeline_mode = #tpu.pipeline_mode<synchronous>, transform_indices = @transform_3, window_bounds = array<i64: 16, 32>}, {transform_indices = @transform_4, window_bounds = array<i64: 2, 1, 16, 64>}]} {
    %c0 = arith.constant 0 : index
    %c0_0 = arith.constant 0 : index
    %c0_1 = arith.constant 0 : index
    %c0_2 = arith.constant 0 : index
    %0 = vector.load %arg1[%c0, %c0_0, %c0_1, %c0_2] : memref<2x1x16x16xf32, #tpu.memory_space<vmem>>, vector<2x1x16x16xf32>
    %cst = arith.constant dense<0.000000e+00> : vector<2x1x16xf32>
    %1 = vector.multi_reduction <add>, %0, %cst [3] : vector<2x1x16x16xf32> to vector<2x1x16xf32>
    %2 = vector.shape_cast %1 : vector<2x1x16xf32> to vector<2x1x16x1xf32>
    %cst_3 = arith.constant dense<0.000000e+00> : vector<2x1x1xf32>
    %3 = vector.multi_reduction <add>, %2, %cst_3 [2] : vector<2x1x16x1xf32> to vector<2x1x1xf32>
    %4 = vector.shape_cast %3 : vector<2x1x1xf32> to vector<2x1x1x1xf32>
    %cst_4 = arith.constant dense<0.000000e+00> : vector<1x1x1xf32>
    %5 = vector.multi_reduction <add>, %4, %cst_4 [0] : vector<2x1x1x1xf32> to vector<1x1x1xf32>
    %6 = vector.shape_cast %5 : vector<1x1x1xf32> to vector<1x1x1x1xf32>
    %cst_5 = arith.constant 5.120000e+02 : f32
    %7 = vector.broadcast %cst_5 : f32 to vector<1x1x1x1xf32>
    %8 = arith.divf %6, %7 : vector<1x1x1x1xf32>
    %9 = vector.broadcast %8 : vector<1x1x1x1xf32> to vector<2x1x16x16xf32>
    %10 = arith.subf %0, %9 : vector<2x1x16x16xf32>
    %11 = arith.mulf %10, %10 : vector<2x1x16x16xf32>
    %cst_6 = arith.constant dense<0.000000e+00> : vector<2x1x16xf32>
    %12 = vector.multi_reduction <add>, %11, %cst_6 [3] : vector<2x1x16x16xf32> to vector<2x1x16xf32>
    %13 = vector.shape_cast %12 : vector<2x1x16xf32> to vector<2x1x16x1xf32>
    %cst_7 = arith.constant dense<0.000000e+00> : vector<2x1x1xf32>
    %14 = vector.multi_reduction <add>, %13, %cst_7 [2] : vector<2x1x16x1xf32> to vector<2x1x1xf32>
    %15 = vector.shape_cast %14 : vector<2x1x1xf32> to vector<2x1x1x1xf32>
    %cst_8 = arith.constant dense<0.000000e+00> : vector<1x1x1xf32>
    %16 = vector.multi_reduction <add>, %15, %cst_8 [0] : vector<2x1x1x1xf32> to vector<1x1x1xf32>
    %17 = vector.shape_cast %16 : vector<1x1x1xf32> to vector<1x1x1x1xf32>
    %cst_9 = arith.constant 5.120000e+02 : f32
    %18 = vector.broadcast %cst_9 : f32 to vector<1x1x1x1xf32>
    %19 = arith.divf %17, %18 : vector<1x1x1x1xf32>
    %cst_10 = arith.constant 9.99999974E-6 : f32
    %20 = vector.broadcast %cst_10 : f32 to vector<1x1x1x1xf32>
    %21 = arith.addf %19, %20 : vector<1x1x1x1xf32>
    %22 = math.rsqrt %21 : vector<1x1x1x1xf32>
    %c0_11 = arith.constant 0 : index
    %c0_12 = arith.constant 0 : index
    %c0_13 = arith.constant 0 : index
    %c0_14 = arith.constant 0 : index
    %23 = vector.load %arg2[%c0_11, %c0_12, %c0_13, %c0_14] : memref<1x1x1x1xf32, #tpu.memory_space<vmem>>, vector<1x1x1x1xf32>
    %24 = arith.mulf %23, %22 : vector<1x1x1x1xf32>
    %25 = vector.broadcast %24 : vector<1x1x1x1xf32> to vector<2x1x16x16xf32>
    %26 = arith.mulf %10, %25 : vector<2x1x16x16xf32>
    %c0_15 = arith.constant 0 : index
    %c0_16 = arith.constant 0 : index
    %c0_17 = arith.constant 0 : index
    %c0_18 = arith.constant 0 : index
    %27 = vector.load %arg3[%c0_15, %c0_16, %c0_17, %c0_18] : memref<1x1x1x1xf32, #tpu.memory_space<vmem>>, vector<1x1x1x1xf32>
    %28 = vector.broadcast %27 : vector<1x1x1x1xf32> to vector<2x1x16x16xf32>
    %29 = arith.addf %26, %28 : vector<2x1x16x16xf32>
    %30 = vector.shape_cast %29 : vector<2x1x16x16xf32> to vector<32x16xf32>
    %c0_19 = arith.constant 0 : index
    %c0_20 = arith.constant 0 : index
    %31 = vector.load %arg4[%c0_19, %c0_20] : memref<16x32xf32, #tpu.memory_space<vmem>>, vector<16x32xf32>
    %cst_21 = arith.constant dense<0.000000e+00> : vector<32x32xf32>
    %32 = tpu.matmul %30, %31, %cst_21 {dimension_numbers = #tpu.dot_dimension_numbers<[1], [0], [0], [1], [0, 0, 1, 1], [], []>, precision = #tpu.contract_precision<fp32>} : vector<32x16xf32>, vector<16x32xf32>, vector<32x32xf32> -> vector<32x32xf32>
    %33 = vector.shape_cast %32 : vector<32x32xf32> to vector<2x1x16x32xf32>
    %c0_22 = arith.constant 0 : index
    %c0_23 = arith.constant 0 : index
    %c0_24 = arith.constant 0 : index
    %c0_25 = arith.constant 0 : index
    %34 = vector.load %arg5[%c0_22, %c0_23, %c0_24, %c0_25] : memref<2x1x16x64xf32, #tpu.memory_space<vmem>>, vector<2x1x16x32xf32>
    tpu.vector_store %arg5[%c0_22, %c0_23, %c0_24, %c0_25], %33 {strides = array<i32>} : memref<2x1x16x64xf32, #tpu.memory_space<vmem>>, vector<2x1x16x32xf32>,
    %c0_26 = arith.constant 0 : index
    %c0_27 = arith.constant 0 : index
    %c0_28 = arith.constant 0 : index
    %c32 = arith.constant 32 : index
    %35 = vector.load %arg5[%c0_26, %c0_27, %c0_28, %c32] : memref<2x1x16x64xf32, #tpu.memory_space<vmem>>, vector<2x1x16x32xf32>
    tpu.vector_store %arg5[%c0_26, %c0_27, %c0_28, %c32], %33 {strides = array<i32>} : memref<2x1x16x64xf32, #tpu.memory_space<vmem>>, vector<2x1x16x32xf32>,
    return
  }
  func.func @transform_0(%arg0: i32) -> (i32, i32, i32, i32) {
    %c0_i32 = arith.constant 0 : i32
    %c0_i32_0 = arith.constant 0 : i32
    %c0_i32_1 = arith.constant 0 : i32
    %c0_i32_2 = arith.constant 0 : i32
    return %c0_i32, %arg0, %c0_i32_0, %c0_i32_1 : i32, i32, i32, i32
  }
  func.func @transform_1(%arg0: i32) -> (i32, i32, i32, i32) {
    %c0_i32 = arith.constant 0 : i32
    %c0_i32_0 = arith.constant 0 : i32
    %c0_i32_1 = arith.constant 0 : i32
    %c0_i32_2 = arith.constant 0 : i32
    return %c0_i32, %arg0, %c0_i32_0, %c0_i32_1 : i32, i32, i32, i32
  }
  func.func @transform_2(%arg0: i32) -> (i32, i32, i32, i32) {
    %c0_i32 = arith.constant 0 : i32
    %c0_i32_0 = arith.constant 0 : i32
    %c0_i32_1 = arith.constant 0 : i32
    %c0_i32_2 = arith.constant 0 : i32
    return %c0_i32, %arg0, %c0_i32_0, %c0_i32_1 : i32, i32, i32, i32
  }
  func.func @transform_3(%arg0: i32) -> (i32, i32) {
    %c0_i32 = arith.constant 0 : i32
    %c0_i32_0 = arith.constant 0 : i32
    %c0_i32_1 = arith.constant 0 : i32
    return %c0_i32, %c0_i32_0 : i32, i32
  }
  func.func @transform_4(%arg0: i32) -> (i32, i32, i32, i32) {
    %c0_i32 = arith.constant 0 : i32
    %c0_i32_0 = arith.constant 0 : i32
    %c0_i32_1 = arith.constant 0 : i32
    %c0_i32_2 = arith.constant 0 : i32
    return %c0_i32, %arg0, %c0_i32_0, %c0_i32_1 : i32, i32, i32, i32
  }
}

</mosaic_0001>

<bundles_post_ra>
// kernel: tpu_custom_call.1
= control target key start
LH: loop header
LB: loop body
LE: loop exit
PB: predicated region body
PF: predicated region fallthrough
CT: control target
= control target key end

     0   :  { %9 = vsyncpa [#allocation3], 0  ;;  %s1714_s0 = inlined_call_operand.hbm [shape: f32[2,4,16,16], index: 0, kind: input, shape index: {}]   ;;  %s1715_s1 = inlined_call_operand.vmem [shape: f32[1,4,1,1], index: 1, kind: input, shape index: {}]   ;;  %s1716_s2 = inlined_call_operand.vmem [shape: f32[1,4,1,1], index: 2, kind: input, shape index: {}]   ;;  %s1717_s3 = inlined_call_operand.hbm [shape: f32[16,32], index: 3, kind: input, shape index: {}]   ;;  %s1718_s4 = inlined_call_operand.hbm [shape: f32[2,4,16,64], index: 4, kind: output, shape index: {}]  }
   0x1   :  { %11 = vsyncpa [#allocation3 + $0x1], 0 }
   0x2   :  { %12 = vsyncpa [#allocation6], 0 }
   0x3   :  { %13 = vsyncpa [#allocation4], 0 }
   0x4   :  { %15 = vsyncpa [#allocation4 + $0x1], 0  ;;  %s1467_s15 = smov 0   ;;  %s1469_s16 = smov 0  }
   0x5   :  { %s1471_s17 = smov 0   ;;  %s1473_s18 = smov 0  }
   0x6 LB: > { %s1488_s19 = sadd.s32 4294967295, %s1422_s18   ;;  %s1151_s20 = sadd.s32 4294967294, %s1422_s18   ;;  %s1422_s18 = sphi %s1473_s18, %s1732_s18   ;;  %s1418_s17 = sphi %s1471_s17, %s1731_s17   ;;  %s1414_s16 = sphi %s1469_s16, %s1730_s16   ;;  %s1410_s15 = sphi %s1467_s15, %s1729_s15  }
   0x7   : > { %s1492_s21 = sadd.s32 1, %s1422_s18   ;;  %s28_s22 = sadd.s32 1, %s1418_s17 }
   0x8   : > { %s25_s23 = ssub.s32 %s1422_s18, %s1492_s21  ;;  %p35_p0 = scmp.ne.s32.totalorder %s1418_s17, %s1414_s16 }
   0x9   : > { %p26_p1 = scmp.eq.s32.totalorder %s25_s23, 0  ;;  %p36_p2 = scmp.eq.s32.totalorder %s1422_s18, 0 }
   0xa   : > { %p41_p3 = scmp.ne.s32.totalorder %s1414_s16, %s1410_s15  ;;  %p42_p4 = scmp.eq.s32.totalorder %s1488_s19, 0 }
   0xb   : > { %s1504_s24 = scalar_select %p26_p1, %s1418_s17, %s28_s22  }
   0xc   : > { %p1506_p5 = por %p36_p2, %p35_p0  ;;  %p1512_p6 = por %p42_p4, %p41_p3 }
   0xd   : > { %p138_p7 = scmp.eq.s32.totalorder %s1488_s19, 3  ;;  %p144_p8 = scmp.eq.s32.totalorder %s1151_s20, 3 }
   0xe   : > { %s1722_s26 = scalar_select %p1512_p6, 1, 0 }
   0xf   : > { %p1152_p9 = scmp.ge.s32.totalorder %s1422_s18, 1  ;;  %p151_p10 = scmp.lt.s32.totalorder %s1422_s18, 5 }
  0x10   : > { %p1519_p11 = por %p138_p7, %p35_p0  ;;  %p1523_p12 = por %p144_p8, %p41_p3 }
  0x11   : > { %p1527_p13 = pnand %p1152_p9, %p151_p10  ;;  %s1424_s30 = smov [#allocation5]  }
  0x12   : > { %s1723_s27 = scalar_select %p1519_p11, 1, 0 }
  0x13   : > { %s1724_s28 = scalar_select %p1523_p12, 1, 0 }
  0x14   : > { %p1289_p1 = pneg %p1527_p13  ;;  %s163_s5 = sshll.u32 %s1424_s30, 4  ;;  %s164_s5 = int_to_ptr.vmem [resolvable:$true] %s163_s5 }
  0x15   : > { %s1365_s6 = scalar_lea.vmem %s164_s5, 256  ;;  %p1373_p8 = scmp.lt.s32.totalorder %s164_s5, %s164_s5 }
  0x16   : > { %p1290_p2 = pnand %p1289_p1, %p42_p4  ;;  %p1366_p7 = scmp.ne.s32.totalorder %s164_s5, %s1365_s6 }
  0x17   : > { %p1374_p6 = scmp.lt.s32.totalorder %s1365_s6, %s1365_s6 }
  0x18   : > { %p1356_p0 = pneg %p1290_p2 }
  0x19   : > { %p1375_p12 = por %p1374_p6, %p1373_p8 }
  0x1a   : > { %p1368_p11 = pnand %p1366_p7, %p1356_p0 }
  0x1c   : > { %p1369_p3 = pneg %p1368_p11 }
  0x1e   : > { %p1376_p9 = pnand %p1375_p12, %p1369_p3 }
  0x20   : > { %1379 = shalt.err (!%p1376_p9)
}
  0x21   : > { %s1425_s7 = smov 128   ;;  %s1426_s8 = smov 8  }
  0x22   : > { %1292 = dma.hbm_to_vmem [thread:$0]  (!%p1290_p2), %s1717_s3, 256, %s164_s5, [#allocation6], %s1425_s7, %s1425_s7, %s1426_s8  }
  0x23   : > { %p1154_p10 = scmp.ge.s32.totalorder %s1422_s18, 4 }
  0x25   : > { %173 = sbr.rel (%p1154_p10) target bundleno = 55 (0x37), region = 20 }
  0x2a   : > { %s177_s11 = sand.u32 1, %s1418_s17   ;;  %s1170_s12 = sshll.u32 %s1422_s18, 8 }
  0x2b   : > { %s1155_s13 = sshll.u32 %s177_s11, 5  ;;  %s187_s22 = scalar_lea.hbm %s1714_s0, %s1170_s12 }
  0x2c   : > { %s1270_s23 = scalar_select %p1506_p5, [#allocation0], [#allocation12] }
  0x2d   : > { %s181_s30 = scalar_lea.vmem [#allocation2], %s1155_s13  ;;  %s1427_s7 = smov 1024  }
  0x2e   : > { %s200_s5 = sshll.u32 %s181_s30, 4  ;;  %s192_s6 = sld [smem:[%s1270_s23]]   ;;  %s201_s5 = int_to_ptr.vmem [resolvable:$true] %s200_s5 }
  0x2f   : > { %1271 = sst [smem:[#allocation9]] (%p1506_p5), %s1427_s7  ;;  %s1428_s8 = smov 256  }
  0x30   : > { %1272 = sst [smem:[#allocation9 + $0x1]] (%p1506_p5), %s1428_s8  ;;  %s1429_s9 = smov 2  }
  0x31   : > { %1273 = sst [smem:[#allocation9 + $0x2]] (%p1506_p5), %s1429_s9  ;;  %s1430_s10 = smov 128  }
  0x32   : > { %1274 = sst [smem:[#allocation9 + $0x3]] (%p1506_p5), %s1430_s10  ;;  %s1431_s13 = smov 8  }
  0x33   : > { %1275 = sst [smem:[#allocation9 + $0x4]] (%p1506_p5), %s1430_s10  ;;  %s178_s20 = scalar_lea.sflag [#allocation3], %s177_s11 }
  0x34   : > { %s1158_s12 = sshll.u32 %s192_s6, 26  ;;  %1276 = sst [smem:[#allocation9 + $0x5]] (%p1506_p5), %s1431_s13 }
  0x35   : > { %s1159_s14 = sadd.s32 134217728, %s1158_s12  ;;  %s1432_s23 = smov 131072  }
  0x36   : > { %1277 = dma.general (%p1506_p5), %s187_s22, 512, %s201_s5, %s178_s20, %s1432_s23, [#allocation9], %s1159_s14, 0  }
  0x37 PF: > { %237 = sbr.rel (%p1527_p13) target bundleno = 902 (0x386), region = 36  ;;  %s1563_s30 = sand.u32 (!%p1527_p13), 1, %s1414_s16  }
  0x38   : > { %s1161_s6 = sshll.u32 (!%p1527_p13), %s1563_s30, 5  ;;  %s240_s7 = scalar_lea.sflag (!%p1527_p13), [#allocation3], %s1563_s30 }
  0x39   : > { %s243_s8 = scalar_lea.vmem (!%p1527_p13), [#allocation2], %s1161_s6  ;;  %p1726_p6 = scmp.ne.s32.totalorder (!%p1527_p13), %s1722_s26, 0 }
  0x3c   : > { %1397 = dma.done.wait (%p1726_p6), %s240_s7, 512  }
  0x3d   : > { %1399 = vsyncadd (%p1726_p6), %s240_s7, 4294966784 }
  0x3e   : > { %1401 = dma.done.wait (%p42_p4), [#allocation6], 256  }
  0x3f   : > { %1403 = vsyncadd (%p42_p4), [#allocation6], 4294967040  ;;  %vm288_vm0 = vcmask 130048   ;;  %v286_v0 = vld [vmem:[%s243_s8 + $0x10] sm:$0xff]  ;;  %v284_v1 = vld [vmem:[%s243_s8] sm:$0xff]  ;;  %v1433_v40 = vmov 0   ;;  %v359_v63 = vlaneseq }
  0x40   : > { %v287_v2 = vld [vmem:[%s243_s8 + $0x18] sm:$0xff]  ;;  %v295_v3 = vsel %vm288_vm0, %v286_v0, 0.0  ;;  %v289_v4 = vsel %vm288_vm0, %v284_v1, 0.0  ;;  %v285_v5 = vld [vmem:[%s243_s8 + $0x8] sm:$0xff]  ;;  %1350 = vset.pattern.permute.xlu0 %v1433_v40  ;;  %1351 = vset.pattern.permute.xlu1 %v1433_v40  ;;  %p278_p4 = scmp.lt.s32.totalorder %s1488_s19, 3  ;;  %vm987_vm1 = vcmask 261120  }
  0x41   : > { %296 = vadd.xlane.f32.xlu1 %v295_v3  ;;  %290 = vadd.xlane.f32.xlu0 %v289_v4  ;;  %v298_v6 = vsel %vm288_vm0, %v287_v2, 0.0  ;;  %v292_v7 = vsel %vm288_vm0, %v285_v5, 0.0  ;;  %v385_v3 = vld [vmem:[#allocation5] sm:$0xff]  ;;  %s1663_s10 = scalar_lea.vmem [#allocation7], %s1161_s6  ;;  %s1434_s12 = smov 32   ;;  %vm1008_vm2 = vcmask 523520  }
  0x42   : > { %s1603_s25 = scalar_select %p278_p4, %s1488_s19, 3 }
  0x43   : > { %s1014_s13 = scalar_lea.sflag [#allocation4], %s1563_s30 }
  0x44   : > { %s283_s11 = scalar_lea.vmem %s1716_s2, %s1603_s25  ;;  %s280_s9 = scalar_lea.vmem %s1715_s1, %s1603_s25 }
  0x45   : > { %299 = vadd.xlane.f32.xlu1 %v298_v6  ;;  %293 = vadd.xlane.f32.xlu0 %v292_v7  ;;  %v1164_v41 = vld [vmem:[%s283_s11] ss:$0 sm:$0xff] }
  0x46   : > { %v356_v6 = vld [vmem:[%s280_s9] sm:$0x1] }
  0xca   : > { %v297_v8 = vpop.xlane.xlu1 %296  ;;  %v291_v9 = vpop.xlane.xlu0 %290 }
  0xce   : > { %v300_v10 = vpop.xlane.xlu1 %299  ;;  %v294_v11 = vpop.xlane.xlu0 %293 }
  0xcf   : > { %v308_v12 = vadd.f32 %v300_v10, %v297_v8  ;;  %v301_v13 = vadd.f32 %v294_v11, %v291_v9 }
  0xd1   : > { %v309_v14 = vrot.slane %v308_v12, 4  ;;  %v302_v15 = vrot.slane %v301_v13, 4 }
  0xd3   : > { %v310_v16 = vadd.f32 %v309_v14, %v308_v12  ;;  %v303_v17 = vadd.f32 %v302_v15, %v301_v13 }
  0xd5   : > { %v311_v18 = vrot.slane %v310_v16, 2  ;;  %v304_v19 = vrot.slane %v303_v17, 2 }
  0xd7   : > { %v312_v20 = vadd.f32 %v311_v18, %v310_v16  ;;  %v305_v21 = vadd.f32 %v304_v19, %v303_v17 }
  0xd9   : > { %v313_v22 = vrot.slane %v312_v20, 1  ;;  %v306_v23 = vrot.slane %v305_v21, 1 }
  0xdb   : > { %v314_v24 = vadd.f32 %v313_v22, %v312_v20  ;;  %v307_v25 = vadd.f32 %v306_v23, %v305_v21 }
  0xdd   : > { %v315_v26 = vadd.f32 %v314_v24, %v307_v25 }
  0xdf   : > { %v317_v27 = vmul.f32 0.001953125, %v315_v26 }
  0xe1   : > { %v1581_v28 = vsub.f32 %v285_v5, %v317_v27  ;;  %v1583_v29 = vsub.f32 %v284_v1, %v317_v27  ;;  %v1585_v30 = vsub.f32 %v287_v2, %v317_v27  ;;  %v1587_v31 = vsub.f32 %v286_v0, %v317_v27  ;;  %v386_v0 = vld [vmem:[#allocation5 + $0x8] sm:$0xff] }
  0xe2   : > { %v360_v1 = vshrl.u32 %v359_v63, 7  ;;  %v1613_v2 = vand.u32 4294901760, %v386_v0  ;;  %v1618_v5 = vand.u32 4294901760, %v385_v3 }
  0xe3   : > { %v323_v32 = vmul.f32 %v1581_v28, %v1581_v28  ;;  %v322_v33 = vmul.f32 %v1583_v29, %v1583_v29  ;;  %v325_v36 = vmul.f32 %v1585_v30, %v1585_v30  ;;  %v324_v37 = vmul.f32 %v1587_v31, %v1587_v31 }
  0xe4   : > { %v1616_v4 = vsub.f32 %v386_v0, %v1613_v2  ;;  %1208 = vmatprep.subr.mxu0 %v1613_v2  ;;  %v361_v7 = vsub.s32 0, %v360_v1  ;;  %v1626_v9 = vsub.f32 %v385_v3, %v1618_v5 }
  0xe5   : > { %v329_v34 = vsel %vm288_vm0, %v323_v32, 0.0  ;;  %v326_v35 = vsel %vm288_vm0, %v322_v33, 0.0  ;;  %v335_v38 = vsel %vm288_vm0, %v325_v36, 0.0  ;;  %v332_v39 = vsel %vm288_vm0, %v324_v37, 0.0  ;;  %1209 = vmatpush3.msra.mxu0 %v1613_v2 }
  0xe6   : > { %330 = vadd.xlane.f32.xlu1 %v329_v34  ;;  %327 = vadd.xlane.f32.xlu0 %v326_v35  ;;  %v1623_v8 = vand.u32 4294901760, %v1616_v4  ;;  %v1633_v13 = vand.u32 4294901760, %v1626_v9 }
  0xe7   : > { %1210 = vmatprep.subr.mxu0 %v1618_v5 }
  0xe8   : > { %1211 = vmatpush3.msra.mxu0 %v1618_v5  ;;  %v538_v12 = vsub.f32 %v1616_v4, %v1623_v8  ;;  %v545_v16 = vsub.f32 %v1626_v9, %v1633_v13 }
  0xe9   : > { %1228 = vmatprep.subr.mxu0 %v1616_v4 }
  0xea   : > { %336 = vadd.xlane.f32.xlu1 %v335_v38  ;;  %333 = vadd.xlane.f32.xlu0 %v332_v39  ;;  %v539_v15 = vand.u32 4294901760, %v538_v12  ;;  %v546_v17 = vand.u32 4294901760, %v545_v16 }
  0xec   : > { %1218 = vmatprep.subr.mxu1 %v539_v15 }
  0xed   : > { %1219 = vmatpush3.msra.mxu1 %v539_v15 }
  0xee   : > { %1220 = vmatprep.subr.mxu1 %v546_v17 }
  0xef   : > { %1221 = vmatpush3.msra.mxu1 %v546_v17 }
  0xf0   : > { %1238 = vmatprep.subr.mxu1 %v1613_v2 }
  0xfb   : > { %378 = vperm.xlu1 %1351, %v1164_v41  }
 0x16f   : > { %v331_v42 = vpop.xlane.xlu1 %330  ;;  %v328_v43 = vpop.xlane.xlu0 %327 }
 0x170   : > { %v338_v44 = vadd.f32 %v331_v42, %v328_v43 }
 0x172   : > { %v339_v45 = vrot.slane %v338_v44, 4 }
 0x173   : > { %v337_v46 = vpop.xlane.xlu1 %336  ;;  %v334_v47 = vpop.xlane.xlu0 %333 }
 0x174   : > { %v340_v48 = vadd.f32 %v339_v45, %v338_v44  ;;  %v345_v49 = vadd.f32 %v337_v46, %v334_v47 }
 0x176   : > { %v341_v50 = vrot.slane %v340_v48, 2  ;;  %v346_v51 = vrot.slane %v345_v49, 4 }
 0x177   : > { %v379_v19 = vpop.permute.xlu1 %378 }
 0x178   : > { %v342_v52 = vadd.f32 %v341_v50, %v340_v48  ;;  %v347_v53 = vadd.f32 %v346_v51, %v345_v49 }
 0x17a   : > { %v348_v54 = vrot.slane %v347_v53, 2  ;;  %v343_v55 = vrot.slane %v342_v52, 1 }
 0x17c   : > { %v349_v56 = vadd.f32 %v348_v54, %v347_v53  ;;  %v344_v58 = vadd.f32 %v343_v55, %v342_v52 }
 0x17e   : > { %v350_v57 = vrot.slane %v349_v56, 1 }
 0x180   : > { %v351_v59 = vadd.f32 %v350_v57, %v349_v56 }
 0x182   : > { %v352_v60 = vadd.f32 %v351_v59, %v344_v58 }
 0x184   : > { %v353_v61 = vmul.f32 0.001953125, %v352_v60 }
 0x186   : > { %v354_v62 = vadd.f32 1e-05, %v353_v61 }
 0x188   : > { %1352 = vrsqrt.f32 %v354_v62 }
 0x195   : > { %v1353_v10 = vpop.eup %1352 }
 0x196   : > { %v357_v11 = vmul.f32 %v1353_v10, %v356_v6 }
 0x198   : > { %v362_v14 = vrot.slane %v357_v11, %v361_v7 }
 0x19a   : > { %364 = vperm.xlu0 %1350, %v362_v14  }
 0x215   : > { %v365_v18 = vpop.permute.xlu0 %364 }
 0x216   : > { %v367_v20 = vmul.f32 %v365_v18, %v1583_v29  ;;  %v368_v21 = vmul.f32 %v365_v18, %v1581_v28  ;;  %v369_v22 = vmul.f32 %v365_v18, %v1587_v31  ;;  %v370_v23 = vmul.f32 %v365_v18, %v1585_v30 }
 0x218   : > { %v381_v24 = vadd.f32 %v379_v19, %v367_v20  ;;  %v382_v25 = vadd.f32 %v379_v19, %v368_v21  ;;  %v383_v26 = vadd.f32 %v379_v19, %v369_v22  ;;  %v384_v27 = vadd.f32 %v379_v19, %v370_v23 }
 0x21a   : > { %v388_v32 = vsel %vm288_vm0, %v381_v24, 0  ;;  %v391_v33 = vsel %vm288_vm0, %v382_v25, 0  ;;  %v394_v34 = vsel %vm288_vm0, %v383_v26, 0  ;;  %v397_v35 = vsel %vm288_vm0, %v384_v27, 0 }
 0x21b   : > { %v466_v36 = vand.u32 4294901760, %v388_v32  ;;  %v476_v29 = vand.u32 4294901760, %v391_v33  ;;  %v486_v37 = vand.u32 4294901760, %v394_v34  ;;  %v496_v28 = vand.u32 4294901760, %v397_v35 }
 0x21d   : > { %1222 = vmatprep.mubr.f32.mxu1 %v466_v36  ;;  %v467_v31 = vsub.f32 %v388_v32, %v466_v36  ;;  %v477_v38 = vsub.f32 %v391_v33, %v476_v29  ;;  %v487_v30 = vsub.f32 %v394_v34, %v486_v37  ;;  %v497_v39 = vsub.f32 %v397_v35, %v496_v28 }
 0x21e   : > { %1223 = vmatmul.mubr.f32.vlgmr.msra.gmra.mxu1 %v476_v29 }
 0x21f   : > { %1225 = vmatprep.mubr.f32.mxu1 %v486_v37  ;;  %1239 = vmatpush3.msra.mxu1 %v1613_v2  ;;  %v468_v40 = vand.u32 4294901760, %v467_v31  ;;  %v478_v41 = vand.u32 4294901760, %v477_v38  ;;  %v488_v42 = vand.u32 4294901760, %v487_v30  ;;  %v498_v43 = vand.u32 4294901760, %v497_v39 }
 0x220   : > { %1240 = vmatprep.subr.mxu1 %v1618_v5 }
 0x221   : > { %v469_v44 = vsub.f32 %v467_v31, %v468_v40  ;;  %1241 = vmatpush3.msra.mxu1 %v1618_v5  ;;  %v479_v45 = vsub.f32 %v477_v38, %v478_v41  ;;  %v489_v46 = vsub.f32 %v487_v30, %v488_v42  ;;  %v499_v49 = vsub.f32 %v497_v39, %v498_v43 }
 0x222   : > { %1226 = vmatmul.mubr.f32.gmra.mxu1 %v496_v28  ;;  %1258 = vmatprep.subr.mxu1 %v1613_v2 }
 0x223   : > { %1242 = vmatprep.mubr.f32.mxu1 %v468_v40  ;;  %v470_v47 = vand.u32 4294901760, %v469_v44  ;;  %v480_v48 = vand.u32 4294901760, %v479_v45  ;;  %v490_v50 = vand.u32 4294901760, %v489_v46  ;;  %v500_v51 = vand.u32 4294901760, %v499_v49 }
 0x225   : > { %1212 = vmatprep.mubr.f32.mxu0 %v470_v47 }
 0x226   : > { %1213 = vmatmul.mubr.f32.vlgmr.msra.gmra.mxu0 %v480_v48  ;;  %1243 = vmatmul.mubr.f32.vlgmr.msra.gmra.mxu1 %v478_v41 }
 0x227   : > { %1229 = vmatpush3.msra.mxu0 %v1616_v4  ;;  %1215 = vmatprep.mubr.f32.mxu0 %v490_v50 }
 0x228   : > { %1245 = vmatprep.mubr.f32.mxu1 %v488_v42  ;;  %1230 = vmatprep.subr.mxu0 %v1626_v9 }
 0x229   : > { %1231 = vmatpush3.msra.mxu0 %v1626_v9  ;;  %1259 = vmatpush3.msra.mxu1 %v1613_v2 }
 0x22a   : > { %1216 = vmatmul.mubr.f32.gmra.mxu0 %v500_v51  ;;  %1246 = vmatmul.mubr.f32.gmra.mxu1 %v498_v43 }
 0x22b   : > { %1232 = vmatprep.mubr.f32.mxu0 %v467_v31  ;;  %1262 = vmatprep.mubr.f32.mxu1 %v466_v36 }
 0x22c   : > { %1260 = vmatprep.subr.mxu1 %v1618_v5  ;;  %1248 = vmatprep.subr.mxu0 %v1623_v8 }
 0x22d   : > { %1261 = vmatpush3.msra.mxu1 %v1618_v5 }
 0x22e   : > { %1233 = vmatmul.mubr.f32.vlgmr.msra.gmra.mxu0 %v477_v38  ;;  %1263 = vmatmul.mubr.f32.vlgmr.msra.gmra.mxu1 %v476_v29 }
 0x22f   : > { %1249 = vmatpush3.msra.mxu0 %v1623_v8  ;;  %1235 = vmatprep.mubr.f32.mxu0 %v487_v30 }
 0x230   : > { %1265 = vmatprep.mubr.f32.mxu1 %v486_v37  ;;  %1250 = vmatprep.subr.mxu0 %v1633_v13 }
 0x231   : > { %1251 = vmatpush3.msra.mxu0 %v1633_v13 }
 0x232   : > { %1236 = vmatmul.mubr.f32.gmra.mxu0 %v497_v39  ;;  %1266 = vmatmul.mubr.f32.gmra.mxu1 %v496_v28 }
 0x233   : > { %1252 = vmatprep.mubr.f32.mxu0 %v466_v36 }
 0x236   : > { %1253 = vmatmul.mubr.f32.vlgmr.msra.gmra.mxu0 %v476_v29 }
 0x237   : > { %1255 = vmatprep.mubr.f32.mxu0 %v486_v37 }
 0x23a   : > { %1256 = vmatmul.mubr.f32.gmra.mxu0 %v496_v28 }
 0x2de   : > { %v1224_v52 = vpop.f32.mrf.mxu1 }
 0x2e0   : > { %v583_v53 = vpop.f32.mrf.mxu1 }
 0x2e2   : > { %v1227_v54 = vpop.f32.mrf.mxu1 }
 0x2e4   : > { %v595_v55 = vpop.f32.mrf.mxu1 }
 0x2e6   : > { %v1214_v56 = vpop.f32.mrf.mxu0  ;;  %v1244_v57 = vpop.f32.mrf.mxu1 }
 0x2e7   : > { %v590_v1 = vadd.f32 %v1224_v52, %v1214_v56 }
 0x2e8   : > { %v472_v58 = vpop.f32.mrf.mxu0  ;;  %v773_v59 = vpop.f32.mrf.mxu1 }
 0x2e9   : > { %v584_v3 = vadd.f32 %v583_v53, %v472_v58 }
 0x2ea   : > { %v1217_v60 = vpop.f32.mrf.mxu0  ;;  %v1247_v61 = vpop.f32.mrf.mxu1 }
 0x2eb   : > { %v602_v7 = vadd.f32 %v1227_v54, %v1217_v60 }
 0x2ec   : > { %v492_v62 = vpop.f32.mrf.mxu0  ;;  %v789_v63 = vpop.f32.mrf.mxu1 }
 0x2ed   : > { %v596_v10 = vadd.f32 %v595_v55, %v492_v62 }
 0x2ee   : > { %v1234_v0 = vpop.f32.mrf.mxu0  ;;  %v1264_v5 = vpop.f32.mrf.mxu1 }
 0x2ef   : > { %v685_v4 = vadd.f32 %v1234_v0, %v590_v1 }
 0x2f0   : > { %v677_v2 = vpop.f32.mrf.mxu0  ;;  %v965_v13 = vpop.f32.mrf.mxu1 }
 0x2f1   : > { %v678_v8 = vadd.f32 %v677_v2, %v584_v3  ;;  %v782_v12 = vadd.f32 %v1244_v57, %v685_v4 }
 0x2f2   : > { %v1237_v6 = vpop.f32.mrf.mxu0  ;;  %v1267_v22 = vpop.f32.mrf.mxu1 }
 0x2f3   : > { %v699_v11 = vadd.f32 %v1237_v6, %v602_v7  ;;  %v774_v17 = vadd.f32 %v773_v59, %v678_v8 }
 0x2f4   : > { %v691_v9 = vpop.f32.mrf.mxu0  ;;  %v977_v34 = vpop.f32.mrf.mxu1 }
 0x2f5   : > { %v692_v15 = vadd.f32 %v691_v9, %v596_v10  ;;  %v798_v21 = vadd.f32 %v1247_v61, %v699_v11 }
 0x2f6   : > { %v1254_v14 = vpop.f32.mrf.mxu0 }
 0x2f7   : > { %v881_v16 = vadd.f32 %v1254_v14, %v782_v12  ;;  %v790_v26 = vadd.f32 %v789_v63, %v692_v15 }
 0x2f8   : > { %v874_v18 = vpop.f32.mrf.mxu0 }
 0x2f9   : > { %v972_v19 = vadd.f32 %v1264_v5, %v881_v16  ;;  %v875_v20 = vadd.f32 %v874_v18, %v774_v17 }
 0x2fa   : > { %v1257_v23 = vpop.f32.mrf.mxu0 }
 0x2fb   : > { %989 = vst.msk [vmem:[%s1663_s10 + $0x8] sm:$0xff] %vm987_vm1, %v972_v19  ;;  %v966_v24 = vadd.f32 %v965_v13, %v875_v20  ;;  %v893_v25 = vadd.f32 %v1257_v23, %v798_v21  ;;  %998 = vrot.lane.b32.xlu1 %v972_v19, %s1434_s12 }
 0x2fc   : > { %v886_v27 = vpop.f32.mrf.mxu0 }
 0x2fd   : > { %988 = vst.msk [vmem:[%s1663_s10] sm:$0xff] %vm987_vm1, %v966_v24  ;;  %v984_v32 = vadd.f32 %v1267_v22, %v893_v25  ;;  %v887_v33 = vadd.f32 %v886_v27, %v790_v26 }
 0x2ff   : > { %991 = vst.msk [vmem:[%s1663_s10 + $0x18] sm:$0xff] %vm987_vm1, %v984_v32  ;;  %v978_v35 = vadd.f32 %v977_v34, %v887_v33  ;;  %996 = vrot.lane.b32.xlu1 %v966_v24, %s1434_s12 }
 0x301   : > { %990 = vst.msk [vmem:[%s1663_s10 + $0x10] sm:$0xff] %vm987_vm1, %v978_v35 }
 0x303   : > { %1000 = vrot.lane.b32.xlu1 %v978_v35, %s1434_s12 }
 0x307   : > { %1002 = vrot.lane.b32.xlu1 %v984_v32, %s1434_s12 }
 0x36d   : > { %v999_v36 = vpop.permute.xlu1 %998 }
 0x36e   : > { %1010 = vst.msk [vmem:[%s1663_s10 + $0x8] sm:$0xff] %vm1008_vm2, %v999_v36 }
 0x371   : > { %v997_v29 = vpop.permute.xlu1 %996 }
 0x372   : > { %1009 = vst.msk [vmem:[%s1663_s10] sm:$0xff] %vm1008_vm2, %v997_v29 }
 0x375   : > { %v1001_v37 = vpop.permute.xlu1 %1000 }
 0x376   : > { %1011 = vst.msk [vmem:[%s1663_s10 + $0x10] sm:$0xff] %vm1008_vm2, %v1001_v37 }
 0x379   : > { %v1003_v28 = vpop.permute.xlu1 %1002 }
 0x37a   : > { %1012 = vst.msk [vmem:[%s1663_s10 + $0x18] sm:$0xff] %vm1008_vm2, %v1003_v28 }
 0x37b   : > { %s1171_s14 = sshll.u32 %s1488_s19, 8  ;;  %s1037_s20 = sshll.u32 %s1663_s10, 4  ;;  %s1038_s20 = int_to_ptr.vmem [resolvable:$true] %s1037_s20 }
 0x37c   : > { %s1026_s7 = scalar_lea.hbm %s1718_s4, %s1171_s14  ;;  %s1435_s8 = smov 256  }
 0x37d   : > { %p1727_p5 = scmp.ne.s32.totalorder %s1723_s27, 0  ;;  %s1436_s30 = smov 1024  }
 0x37e   : > { %s1437_s25 = smov 2   ;;  %s1438_s26 = smov 128  }
 0x37f   : > { %1281 = sst [smem:[#allocation11]] (%p1727_p5), %s1435_s8  ;;  %s1439_s19 = smov 8  }
 0x380   : > { %1282 = sst [smem:[#allocation11 + $0x1]] (%p1727_p5), %s1436_s30  ;;  %s1440_s29 = smov 131072  }
 0x381   : > { %1283 = sst [smem:[#allocation11 + $0x2]] (%p1727_p5), %s1437_s25  ;;  %s1441_s11 = smov 0  }
 0x382   : > { %1284 = sst [smem:[#allocation11 + $0x3]] (%p1727_p5), %s1438_s26 }
 0x383   : > { %1285 = sst [smem:[#allocation11 + $0x4]] (%p1727_p5), %s1438_s26 }
 0x384   : > { %1286 = sst [smem:[#allocation11 + $0x5]] (%p1727_p5), %s1439_s19 }
 0x385   : > { %1287 = dma.general (%p1727_p5), %s1038_s20, 512, %s1026_s7, %s1014_s13, %s1440_s29, [#allocation11], %s1441_s11, 0  }
 0x386 PF: > { %p1299_p11 = scmp.ge.s32.totalorder %s1422_s18, 2  ;;  %s1065_s22 = sand.u32 1, %s1410_s15  }
 0x387   : > { %p1728_p12 = scmp.ne.s32.totalorder %s1724_s28, 0  ;;  %s1066_s5 = scalar_lea.sflag [#allocation4], %s1065_s22 }
 0x389   : > { %p1294_p13 = pnand %p1299_p11, %p1728_p12 }
 0x38b   : > { %p1295_p1 = pneg %p1294_p13 }
 0x38d   : > { %1405 = dma.done.wait (%p1295_p1), %s1066_s5, 512  }
 0x38e   : > { %1407 = vsyncadd (%p1295_p1), %s1066_s5, 4294966784  ;;  %p18_p2 = scmp.ge.s32.totalorder %s1492_s21, 6   ;;  %s1729_s15 = smov %s1414_s16 }
 0x38f   : > { %s1730_s16 = smov %s1418_s17  ;;  %s1731_s17 = smov %s1504_s24 }
 0x390   : > { %s1732_s18 = smov %s1492_s21  ;;  %20 = sbr.rel (!%p18_p2) target bundleno = 6 (0x6), region = 101 }
 0x395   :  { %1071 = vsyncpa [#allocation3], 1 }
 0x396   :  { %1073 = vsyncpa [#allocation3 + $0x1], 1 }
 0x397   :  { %1074 = vsyncpa [#allocation6], 1 }
 0x398   :  { %1075 = vsyncpa [#allocation4], 1 }
 0x399   :  { %1077 = vsyncpa [#allocation4 + $0x1], 1 }

</bundles_post_ra>
